<compile_context>
chip_gen: v5e
topology: v5e:2x2
jax: 0.10.0
libtpu: 0.0.40
codegen_flags: <defaults>
</compile_context>

<pallas_src>
import jax
import jax.numpy as jnp
from jax.experimental import pallas as pl
from jax.experimental.pallas import tpu as pltpu


def _attn_pool_kernel(x_ref, w_ref, o_ref):
    # x_ref: (TB, S, H) input tile; w_ref: (1, H) attn weight; o_ref: (TB, H).
    w = w_ref[...].astype(jnp.float32)                       # (1, H)

    # Linear(hidden_dim, 1) without bias (scalar bias cancels in the softmax):
    # scores[b, s] = sum_h x[b, s, h] * w[h]  -> (TB, S), lane-dense.
    scores = jnp.sum(x_ref[...].astype(jnp.float32) * w[None, :, :], axis=-1)

    # Softmax over the sequence axis (last axis of `scores`).
    m = jnp.max(scores, axis=-1, keepdims=True)               # (TB, 1)
    e = jnp.exp(scores - m)                                   # (TB, S)
    attn = e / jnp.sum(e, axis=-1, keepdims=True)             # exact divide

    # context[b, h] = sum_s attn[b, s] * x[b, s, h].  Re-read the VMEM tile
    # instead of keeping an f32 copy live across the softmax (halves live
    # VMEM/vreg pressure for bf16 inputs; the tile is already resident).
    ctx = jnp.sum(attn[:, :, None] * x_ref[...].astype(jnp.float32), axis=1)
    o_ref[...] = ctx.astype(o_ref.dtype)


def _vmem_capacity_bytes():
    try:
        return int(pltpu.get_tpu_info().vmem_capacity_bytes)
    except Exception:
        return 64 << 20  # conservative: v7x per-TensorCore VMEM


def _pick_tb(B, S, H, itemsize, vmem_capacity_bytes):
    """Batch-tile size.  Raw input tile capped at ~2 MiB (or VMEM/32).

    Double buffering doubles the raw tile and the in-kernel f32 intermediates
    roughly triple live bytes, so a ~2 MiB raw tile keeps total VMEM use well
    under the 32 MiB scoped request on every generation (incl. v7x 64 MiB/TC)
    while already sitting at ~85% of the HBM roofline.
    Invariant: returned TB == B, or TB % 8 == 0 (sublane-dense output blocks).
    """
    budget = max(1 << 20, min(2 << 20, vmem_capacity_bytes // 32))
    row_bytes = max(1, S * H * itemsize)
    tb = max(1, budget // row_bytes)

    if tb >= B:
        if B >= 16:
            # Whole batch would fit one tile, but split into >= 2 steps so both
            # v7x TensorCores stream this memory-bound kernel and the DMA
            # pipeline has something to overlap.
            tb = max(8, ((B // 2) // 8) * 8)
        else:
            tb = B  # tiny batch: single full-dim block
    elif B >= 8:
        tb = max(8, (tb // 8) * 8)
    else:
        # B < 8 with rows larger than the budget: fall back to one block.
        # (Realistic TextBranch shapes — H = 2*lstm_hidden, modest S — never
        # hit this; an online-softmax split over S is not worth the code.)
        tb = B
    return int(min(tb, B))


def _input_block_spec(tb, S, H, n_steps):
    idx = lambda i: (i, 0, 0)
    if n_steps >= 4:
        try:
            # Small tiles + many steps: 3-deep buffering hides exposed DMA
            # latency at negligible VMEM cost.
            return pl.BlockSpec((tb, S, H), idx, pipeline_mode=pl.Buffered(3))
        except TypeError:
            pass
    return pl.BlockSpec((tb, S, H), idx)


def attention_forward(lstm_output, w, b=None):
    """lstm_output: (B, S, H); w: (1, H); b: (1,) or None.  Returns (B, H).

    `b` is accepted for interface parity with nn.Linear(hidden_dim, 1) but is
    a mathematical no-op: a scalar added uniformly along the softmax axis
    cancels in the softmax, so it is never transferred to the kernel.
    """
    del b  # cancels exactly in softmax over the sequence axis
    B, S, H = lstm_output.shape
    itemsize = jnp.dtype(lstm_output.dtype).itemsize

    tb = _pick_tb(B, S, H, itemsize, _vmem_capacity_bytes())
    n_steps = pl.cdiv(B, tb)

    w2d = jnp.asarray(w, dtype=jnp.float32).reshape(1, H)

    out_dtype = lstm_output.dtype
    cost = pl.CostEstimate(
        flops=4 * B * S * H,                      # score mul-add + weighted sum
        transcendentals=B * S,                    # exp
        bytes_accessed=B * S * H * itemsize
        + B * H * jnp.dtype(out_dtype).itemsize
        + H * 4,
    )

    # No jnp.pad: if tb doesn't divide B, the ragged final block uses a
    # truncated input DMA and masked output stores; rows past B are
    # row-independent garbage that is never written back.
    return pl.pallas_call(
        _attn_pool_kernel,
        out_shape=jax.ShapeDtypeStruct((B, H), out_dtype),
        grid_spec=pltpu.PrefetchScalarGridSpec(
            num_scalar_prefetch=0,
            grid=(n_steps,),
            in_specs=[
                _input_block_spec(tb, S, H, n_steps),            # batch tile
                pl.BlockSpec((1, H), lambda i: (0, 0)),          # attn weight
            ],
            out_specs=pl.BlockSpec((tb, H), lambda i: (i, 0)),
        ),
        compiler_params=pltpu.CompilerParams(
            dimension_semantics=("parallel",),
            vmem_limit_bytes=32 << 20,    # > v5e 16 MiB default, < v7x 64 MiB/TC
        ),
        cost_estimate=cost,
    )(lstm_output, w2d)


if __name__ == "__main__":
    key = jax.random.PRNGKey(0)
    B, S, H = 2, 8, 32   # batch, seq, hidden (lstm_hidden*2 in TextBranch)

    k_x, k_w, k_b = jax.random.split(key, 3)
    x = jax.random.normal(k_x, (B, S, H), dtype=jnp.float32)
    # Synthetic "Linear(hidden_dim, 1)" parameters.
    w = jax.random.normal(k_w, (1, H), dtype=jnp.float32) * 0.1
    b = jax.random.normal(k_b, (1,), dtype=jnp.float32) * 0.1

    out = jax.block_until_ready(attention_forward(x, w, b))

    # Pure-JAX reference (with bias — it cancels through the softmax).
    scores_ref = jnp.einsum("bsh,oh->bso", x, w) + b          # (B, S, 1)
    attn_ref = jax.nn.softmax(scores_ref, axis=1)              # softmax over seq
    context_ref = jnp.sum(attn_ref * x, axis=1)                # (B, H)

    assert out.shape == (B, H)
    assert jnp.allclose(out, context_ref, atol=1e-4, rtol=1e-4)
    print("KERNEL_OK")
</pallas_src>

<mosaic_0001>
module attributes {stable_mosaic.version = 11 : i64} {
  func.func @_attn_pool_kernel(%arg0: i32, %arg1: memref<2x8x32xf32, #tpu.memory_space<vmem>>, %arg2: memref<1x32xf32, #tpu.memory_space<vmem>>, %arg3: memref<2x32xf32, #tpu.memory_space<vmem>>) attributes {dimension_semantics = [#tpu.dimension_semantics<parallel>], iteration_bounds = array<i64: 1>, scalar_prefetch = 0 : i64, scratch_operands = 0 : i64, tpu.core_type = #tpu.core_type<tc>, window_params = [{transform_indices = @transform_0, window_bounds = array<i64: 2, 8, 32>}, {pipeline_mode = #tpu.pipeline_mode<synchronous>, transform_indices = @transform_1, window_bounds = array<i64: 1, 32>}, {transform_indices = @transform_2, window_bounds = array<i64: 2, 32>}]} {
    %c0 = arith.constant 0 : index
    %c0_0 = arith.constant 0 : index
    %0 = vector.load %arg2[%c0, %c0_0] : memref<1x32xf32, #tpu.memory_space<vmem>>, vector<1x32xf32>
    %c0_1 = arith.constant 0 : index
    %c0_2 = arith.constant 0 : index
    %c0_3 = arith.constant 0 : index
    %1 = vector.load %arg1[%c0_1, %c0_2, %c0_3] : memref<2x8x32xf32, #tpu.memory_space<vmem>>, vector<2x8x32xf32>
    %2 = vector.shape_cast %0 : vector<1x32xf32> to vector<1x1x32xf32>
    %3 = vector.broadcast %2 : vector<1x1x32xf32> to vector<2x8x32xf32>
    %4 = arith.mulf %1, %3 : vector<2x8x32xf32>
    %cst = arith.constant dense<0.000000e+00> : vector<2x8xf32>
    %5 = vector.multi_reduction <add>, %4, %cst [2] : vector<2x8x32xf32> to vector<2x8xf32>
    %cst_4 = arith.constant dense<0xFF800000> : vector<2xf32>
    %6 = vector.multi_reduction <maximumf>, %5, %cst_4 [1] : vector<2x8xf32> to vector<2xf32>
    %7 = vector.shape_cast %6 : vector<2xf32> to vector<2x1xf32>
    %8 = vector.broadcast %7 : vector<2x1xf32> to vector<2x8xf32>
    %9 = arith.subf %5, %8 : vector<2x8xf32>
    %10 = math.exp %9 : vector<2x8xf32>
    %cst_5 = arith.constant dense<0.000000e+00> : vector<2xf32>
    %11 = vector.multi_reduction <add>, %10, %cst_5 [1] : vector<2x8xf32> to vector<2xf32>
    %12 = vector.shape_cast %11 : vector<2xf32> to vector<2x1xf32>
    %13 = vector.broadcast %12 : vector<2x1xf32> to vector<2x8xf32>
    %14 = arith.divf %10, %13 : vector<2x8xf32>
    %15 = vector.shape_cast %14 : vector<2x8xf32> to vector<2x8x1xf32>
    %c0_6 = arith.constant 0 : index
    %c0_7 = arith.constant 0 : index
    %c0_8 = arith.constant 0 : index
    %16 = vector.load %arg1[%c0_6, %c0_7, %c0_8] : memref<2x8x32xf32, #tpu.memory_space<vmem>>, vector<2x8x32xf32>
    %17 = vector.broadcast %15 : vector<2x8x1xf32> to vector<2x8x32xf32>
    %18 = arith.mulf %17, %16 : vector<2x8x32xf32>
    %cst_9 = arith.constant dense<0.000000e+00> : vector<2x32xf32>
    %19 = vector.multi_reduction <add>, %18, %cst_9 [1] : vector<2x8x32xf32> to vector<2x32xf32>
    %c0_10 = arith.constant 0 : index
    %c0_11 = arith.constant 0 : index
    %20 = vector.load %arg3[%c0_10, %c0_11] : memref<2x32xf32, #tpu.memory_space<vmem>>, vector<2x32xf32>
    tpu.vector_store %arg3[%c0_10, %c0_11], %19 {strides = array<i32>} : memref<2x32xf32, #tpu.memory_space<vmem>>, vector<2x32xf32>,
    return
  }
  func.func @transform_0(%arg0: i32) -> (i32, i32, i32) {
    %c0_i32 = arith.constant 0 : i32
    %c0_i32_0 = arith.constant 0 : i32
    %c0_i32_1 = arith.constant 0 : i32
    return %arg0, %c0_i32, %c0_i32_0 : i32, i32, i32
  }
  func.func @transform_1(%arg0: i32) -> (i32, i32) {
    %c0_i32 = arith.constant 0 : i32
    %c0_i32_0 = arith.constant 0 : i32
    %c0_i32_1 = arith.constant 0 : i32
    return %c0_i32, %c0_i32_0 : i32, i32
  }
  func.func @transform_2(%arg0: i32) -> (i32, i32) {
    %c0_i32 = arith.constant 0 : i32
    %c0_i32_0 = arith.constant 0 : i32
    return %arg0, %c0_i32 : i32, i32
  }
}

</mosaic_0001>

<bundles_post_ra>
// kernel: tpu_custom_call.1
= control target key start
LH: loop header
LB: loop body
LE: loop exit
PB: predicated region body
PF: predicated region fallthrough
CT: control target
= control target key end

     0   :  { %7 = vsyncpa [#allocation3], 0  ;;  %s324_s0 = inlined_call_operand.hbm [shape: f32[2,8,32], index: 0, kind: input, shape index: {}]   ;;  %s325_s1 = inlined_call_operand.hbm [shape: f32[1,32], index: 1, kind: input, shape index: {}]   ;;  %s326_s2 = inlined_call_operand.hbm [shape: f32[2,32], index: 2, kind: output, shape index: {}]  }
   0x1   :  { %8 = vsyncpa [#allocation6], 0 }
   0x2   :  { %9 = vsyncpa [#allocation4], 0  ;;  %s14_s11 = sshll.u32 %s324_s0, 4  ;;  %s277_s12 = smov [#allocation2]   ;;  %s15_s11 = int_to_ptr.hbm [resolvable:$true] %s14_s11 }
   0x3   :  { %s16_s13 = sshll.u32 %s277_s12, 4  ;;  %s28_s16 = sshll.u32 %s325_s1, 4  ;;  %s17_s13 = int_to_ptr.vmem [resolvable:$true] %s16_s13  ;;  %s29_s16 = int_to_ptr.hbm [resolvable:$true] %s28_s16 }
   0x4   :  { %s278_s17 = smov 128   ;;  %s279_s18 = smov 8  }
   0x5   :  { %22 = dma.hbm_to_vmem [thread:$0]  %s15_s11, 256, %s17_s13, [#allocation3], %s278_s17, %s278_s17, %s279_s18  }
   0x6   :  { %s280_s19 = smov [#allocation5]  }
   0x7   :  { %s30_s20 = sshll.u32 %s280_s19, 4  ;;  %s31_s20 = int_to_ptr.vmem [resolvable:$true] %s30_s20 }
   0x8   :  { %33 = dma.hbm_to_vmem [thread:$0]  %s29_s16, 16, %s31_s20, [#allocation6]  }
   0x9   :  { %271 = dma.done.wait [#allocation3], 256  }
   0xa   :  { %272 = vsyncadd [#allocation3], 4294967040 }
   0xb   :  { %273 = dma.done.wait [#allocation6], 16  }
   0xc   :  { %274 = vsyncadd [#allocation6], 4294967280  ;;  %v304_v0 = vld [vmem:[#allocation2] sm:$0xff]  ;;  %v190_v1 = vld [vmem:[#allocation5] ss:$0 sm:$0xff]  ;;  %vm50_vm0 = vcmask 261120   ;;  %v59_v8 = vlaneseq }
   0xd   :  { %v48_v2 = vmul.f32 %v190_v1, %v304_v0  ;;  %v307_v3 = vld [vmem:[#allocation2 + $0x8] sm:$0xff]  ;;  %vm63_vm1 = vcmask 1041409   ;;  %vm66_vm2 = vcmask 58368   ;;  %v281_v15 = vmov 0   ;;  %s282_s0 = smov [#allocation7]   ;;  %s170_s23 = sshll.u32 %s326_s2, 4  ;;  %s171_s23 = int_to_ptr.hbm [resolvable:$true] %s170_s23 }
   0xe   :  { %v49_v5 = vmul.f32 %v190_v1, %v307_v3  ;;  %v60_v9 = vand.u32 127, %v59_v8  ;;  %188 = vset.pattern.permute.xlu2 %v281_v15  ;;  %187 = vset.pattern.permute.xlu1 %v281_v15  ;;  %s168_s1 = sshll.u32 %s282_s0, 4  ;;  %vm161_vm11 = vcmask 254976   ;;  %s169_s1 = int_to_ptr.vmem [resolvable:$true] %s168_s1 }
   0xf   :  { %v51_v4 = vsel %vm50_vm0, %v48_v2, 0.0  ;;  %189 = vset.pattern.permute.xlu0 %v281_v15 }
  0x10   :  { %52 = vadd.xlane.f32.xlu0 %v51_v4  ;;  %v54_v6 = vsel %vm50_vm0, %v49_v5, 0.0 }
  0x18   :  { %55 = vadd.xlane.f32.xlu0 %v54_v6 }
  0x83   :  { %v53_v7 = vpop.xlane.xlu0 %52 }
  0x84   :  { %v61_v11 = vperm.slane %v53_v7, %v60_v9 }
  0x8b   :  { %v56_v10 = vpop.xlane.xlu0 %55 }
  0x8c   :  { %v62_v12 = vperm.slane %v56_v10, %v60_v9 }
  0x8e   :  { %v64_v13 = vsel %vm63_vm1, %v62_v12, %v61_v11 }
  0x8f   :  { %v67_v14 = vsel %vm66_vm2, %v64_v13, -inf }
  0x90   :  { %68 = vmax.xlane.f32.xlu1 %v67_v14 }
 0x103   :  { %v69_v16 = vpop.xlane.xlu1 %68 }
 0x104   :  { %v71_v17 = vperm.slane %v69_v16, 0  ;;  %v72_v18 = vperm.slane %v69_v16, 1 }
 0x106   :  { %v75_v19 = vsub.f32 %v53_v7, %v71_v17  ;;  %v76_v20 = vsub.f32 %v56_v10, %v72_v18 }
 0x108   :  { %v77_v21 = vmul.f32 1.442695, %v75_v19  ;;  %v79_v22 = vmul.f32 1.442695, %v76_v20 }
 0x10a   :  { %191 = vpow2.f32 %v77_v21 }
 0x10b   :  { %193 = vpow2.f32 %v79_v22 }
 0x110   :  { %v192_v23 = vpop.eup %191 }
 0x111   :  { %v194_v24 = vpop.eup %193  ;;  %84 = vperm.xlu1 %187, %v192_v23  }
 0x112   :  { %87 = vperm.xlu2 %188, %v194_v24  }
 0x16c   :  { %v88_v25 = vpop.permute.xlu2 %87 }
 0x16d   :  { %v90_v27 = vperm.slane %v88_v25, %v60_v9 }
 0x183   :  { %v85_v26 = vpop.permute.xlu1 %84 }
 0x184   :  { %v89_v28 = vperm.slane %v85_v26, %v60_v9 }
 0x186   :  { %v91_v29 = vsel %vm63_vm1, %v90_v27, %v89_v28 }
 0x187   :  { %v93_v30 = vsel %vm66_vm2, %v91_v29, 0.0 }
 0x188   :  { %94 = vadd.xlane.f32.xlu2 %v93_v30 }
 0x1fb   :  { %v95_v31 = vpop.xlane.xlu2 %94 }
 0x1fc   :  { %v97_v32 = vperm.slane %v95_v31, 0  ;;  %v98_v33 = vperm.slane %v95_v31, 1 }
 0x1fe   :  { %195 = vrcp.f32 %v97_v32  ;;  %v112_v40 = vand.u32 2147483648, %v97_v32  ;;  %v127_v41 = vand.u32 2147483648, %v98_v33  ;;  %v110_v43 = vand.u32 2147483647, %v97_v32 }
 0x1ff   :  { %197 = vrcp.f32 %v98_v33  ;;  %v125_v45 = vand.u32 2147483647, %v98_v33  ;;  %vm106_vm5 = vweird.f32 %v97_v32  ;;  %vm121_vm6 = vweird.f32 %v98_v33 }
 0x200   :  { %v113_v48 = vor.u32 1.1754944e-38, %v112_v40  ;;  %v128_v49 = vor.u32 1.1754944e-38, %v127_v41  ;;  %vm111_vm9 = vcmp.eq.f32.partialorder %v110_v43, 8.507059e+37 }
 0x201   :  { %vm126_vm10 = vcmp.eq.f32.partialorder %v125_v45, 8.507059e+37 }
 0x204   :  { %v196_v34 = vpop.eup %195 }
 0x205   :  { %v198_v35 = vpop.eup %197  ;;  %v102_v36 = vmul.f32 %v196_v34, %v97_v32  ;;  %vm107_vm3 = vweird.f32 %v196_v34 }
 0x206   :  { %v117_v37 = vmul.f32 %v198_v35, %v98_v33  ;;  %vm122_vm4 = vweird.f32 %v198_v35  ;;  %vm108_vm7 = vmor %vm106_vm5, %vm107_vm3 }
 0x207   :  { %v103_v38 = vsub.f32 1.0, %v102_v36  ;;  %vm123_vm8 = vmor %vm121_vm6, %vm122_vm4 }
 0x208   :  { %v118_v39 = vsub.f32 1.0, %v117_v37 }
 0x209   :  { %v104_v42 = vmul.f32 %v196_v34, %v103_v38 }
 0x20a   :  { %v119_v44 = vmul.f32 %v198_v35, %v118_v39 }
 0x20b   :  { %v105_v46 = vadd.f32 %v196_v34, %v104_v42 }
 0x20c   :  { %v120_v47 = vadd.f32 %v198_v35, %v119_v44 }
 0x20d   :  { %v109_v50 = vsel %vm108_vm7, %v196_v34, %v105_v46 }
 0x20e   :  { %v124_v51 = vsel %vm123_vm8, %v198_v35, %v120_v47  ;;  %v114_v52 = vsel %vm111_vm9, %v113_v48, %v109_v50 }
 0x20f   :  { %v129_v53 = vsel %vm126_vm10, %v128_v49, %v124_v51  ;;  %v115_v54 = vmul.f32 %v192_v23, %v114_v52 }
 0x210   :  { %v130_v55 = vmul.f32 %v194_v24, %v129_v53 }
 0x211   :  { %133 = vperm.xlu0 %189, %v115_v54  }
 0x212   :  { %138 = vperm.xlu1 %187, %v130_v55  }
 0x283   :  { %v134_v56 = vpop.permute.xlu0 %133 }
 0x284   :  { %v139_v57 = vpop.permute.xlu1 %138  ;;  %v141_v58 = vmul.f32 %v134_v56, %v304_v0 }
 0x285   :  { %v142_v59 = vmul.f32 %v139_v57, %v307_v3 }
 0x286   :  { %v143_v60 = vsel %vm50_vm0, %v141_v58, 0.0 }
 0x287   :  { %v150_v61 = vsel %vm50_vm0, %v142_v59, 0.0  ;;  %v144_v62 = vrot.slane %v143_v60, 4 }
 0x288   :  { %v151_v63 = vrot.slane %v150_v61, 4 }
 0x289   :  { %v145_v1 = vadd.f32 %v144_v62, %v143_v60 }
 0x28a   :  { %v152_v2 = vadd.f32 %v151_v63, %v150_v61 }
 0x28b   :  { %v146_v4 = vrot.slane %v145_v1, 2 }
 0x28c   :  { %v153_v5 = vrot.slane %v152_v2, 2 }
 0x28d   :  { %v147_v6 = vadd.f32 %v146_v4, %v145_v1 }
 0x28e   :  { %v154_v7 = vadd.f32 %v153_v5, %v152_v2 }
 0x28f   :  { %v148_v8 = vrot.slane %v147_v6, 1 }
 0x290   :  { %v155_v9 = vrot.slane %v154_v7, 1 }
 0x291   :  { %v149_v0 = vadd.f32 %v148_v8, %v147_v6 }
 0x292   :  { %v156_v3 = vadd.f32 %v155_v9, %v154_v7 }
 0x294   :  { %v159_v10 = vsel %vm63_vm1, %v156_v3, %v149_v0 }
 0x295   :  { %162 = vst.msk [vmem:[#allocation7] sm:$0x3] %vm161_vm11, %v159_v10 }
 0x296   :  { %173 = dma.vmem_to_hbm [thread:$0]  %s169_s1, 32, %s171_s23, [#allocation4]  }
 0x297   :  { %275 = dma.done.wait [#allocation4], 32  }
 0x298   :  { %276 = vsyncadd [#allocation4], 4294967264 }
 0x299   :  { %178 = vsyncpa [#allocation3], 1 }
 0x29a   :  { %179 = vsyncpa [#allocation6], 1 }
 0x29b   :  { %180 = vsyncpa [#allocation4], 1 }

</bundles_post_ra>
